<compile_context>
chip_gen: v5e
topology: v5e:2x2
jax: 0.10.0
libtpu: 0.0.40
codegen_flags: <defaults>
</compile_context>

<pallas_src>
import jax
import jax.numpy as jnp
from jax.experimental import pallas as pl
from jax.experimental.pallas import tpu as pltpu


_VMEM_LIMIT_BYTES = 32 * 1024 * 1024  # also leaves headroom on v7x (64 MiB physical)


def _round_up(x, m):
    return (x + m - 1) // m * m


def _heads_kernel(x_ref, w_ref, b_ref, out_ref):
    """Fused head GEMM: f32 MXU operands, f32 accumulate + bias, bf16 store."""
    acc = jnp.dot(x_ref[...], w_ref[...], preferred_element_type=jnp.float32)
    out_ref[...] = (acc + b_ref[...]).astype(out_ref.dtype)


def _choose_tm(n, h, out_pad, tm_max):
    """Row-tile size: multiple of 16, >=2 grid steps for moderate N (so v7x's
    two TensorCores both get work), clamped to the scoped-VMEM budget."""
    if n >= 2 * tm_max:
        tm = tm_max
    else:
        tm = min(tm_max, _round_up(max(pl.cdiv(n, 2), 8), 16))

    def tile_bytes(t):
        # double-buffered x tile (f32) + out tile (bf16) + weights/bias (worst
        # case 2 copies each even though their block index is constant)
        return (2 * t * h * 4 + 2 * t * out_pad * 2
                + 2 * h * out_pad * 4 + 2 * out_pad * 4)

    while tm > 16 and tile_bytes(tm) > _VMEM_LIMIT_BYTES // 2:
        tm = max(16, _round_up(tm // 2, 16))
    return tm


def _run_heads(x2d, w_fused, b_fused, *, tm_max=1024):
    """x2d: (N, H) f32.  w_fused: (H, OUT_PAD) f32.  b_fused: (1, OUT_PAD) f32.

    Returns the (N, OUT_PAD) bf16 fused head output."""
    n, h = x2d.shape
    out_pad = w_fused.shape[1]

    tm = _choose_tm(n, h, out_pad, tm_max)
    grid = (pl.cdiv(n, tm),)   # last tile may overhang; OOB rows are dropped

    cost = pl.CostEstimate(
        flops=2 * n * h * out_pad,
        transcendentals=0,
        bytes_accessed=(n * h * 4            # x read (f32, streamed once)
                        + h * out_pad * 4    # fused weight read (resident)
                        + out_pad * 4        # bias read
                        + n * out_pad * 2),  # bf16 output write
    )

    out = pl.pallas_call(
        _heads_kernel,
        out_shape=jax.ShapeDtypeStruct((n, out_pad), jnp.bfloat16),
        grid_spec=pltpu.PrefetchScalarGridSpec(
            num_scalar_prefetch=0,
            grid=grid,
            in_specs=[
                pl.BlockSpec((tm, h), lambda i: (i, 0)),        # x row tile
                pl.BlockSpec((h, out_pad), lambda i: (0, 0)),   # weights resident
                pl.BlockSpec((1, out_pad), lambda i: (0, 0)),   # bias resident
            ],
            out_specs=pl.BlockSpec((tm, out_pad), lambda i: (i, 0)),
        ),
        compiler_params=pltpu.CompilerParams(
            dimension_semantics=("parallel",),
            vmem_limit_bytes=_VMEM_LIMIT_BYTES,
        ),
        cost_estimate=cost,
    )(x2d, w_fused, b_fused)

    return out


def _fuse_head_params(w_mean, b_mean, w_disc, b_disc, *, lane_pad=128):
    """Concatenate the two heads on the output axis, zero-pad to 128 lanes."""
    out_dim = w_mean.shape[1] + w_disc.shape[1]
    out_pad = _round_up(out_dim, lane_pad)
    w = jnp.concatenate([w_mean, w_disc], axis=1)
    b = jnp.concatenate([b_mean, b_disc], axis=1)
    w = jnp.pad(w, ((0, 0), (0, out_pad - out_dim)))
    b = jnp.pad(b, ((0, 0), (0, out_pad - out_dim)))
    return w, b


def init_params(key, in_features, cont_action_dim, discrete_action_dim,
                num_discrete_actions, init_log_std=-0.51):
    """nn.Linear-style init (uniform +/- 1/sqrt(H)); fused/padded head weight
    precomputed once at init time (kept f32 for parity with the torch module)."""
    k1, k2, k3, k4 = jax.random.split(key, 4)
    bound = 1.0 / jnp.sqrt(jnp.float32(in_features))
    d_tot = discrete_action_dim * num_discrete_actions
    # stored transposed (H, out) relative to nn.Linear's (out, H)
    w_mean = jax.random.uniform(k1, (in_features, cont_action_dim),
                                jnp.float32, -bound, bound)
    b_mean = jax.random.uniform(k2, (1, cont_action_dim),
                                jnp.float32, -bound, bound)
    w_disc = jax.random.uniform(k3, (in_features, d_tot),
                                jnp.float32, -bound, bound)
    b_disc = jax.random.uniform(k4, (1, d_tot), jnp.float32, -bound, bound)
    w_fused, b_fused = _fuse_head_params(w_mean, b_mean, w_disc, b_disc)
    return {
        "w_mean": w_mean, "b_mean": b_mean,
        "w_disc": w_disc, "b_disc": b_disc,
        "log_std": jnp.full((1, cont_action_dim), init_log_std, jnp.float32),
        "w_fused": w_fused, "b_fused": b_fused,
    }


def rnn_mixed_policy_forward(params, body_x, hidden_state=None, *,
                             cont_action_dim, discrete_action_dim,
                             num_discrete_actions, use_pallas=None,
                             min_rows_for_pallas=512):
    """Mirror of RNNMixedPolicy.forward when body_x is provided.

    Returns ((mean_cont, std), discrete_logits, body_x, hidden_state) where
    (mean_cont, std) parameterize Independent(Normal(...), 1) and
    discrete_logits parameterize Categorical(logits=...).

    use_pallas=None auto-dispatches: small N uses a plain (XLA-fusable)
    jnp.dot, large N uses the fused Pallas head kernel.  Raise
    min_rows_for_pallas (~few thousand) on v7x where HBM is faster and the
    fixed launch cost dominates longer.
    """
    # TODO(synk): body_net (the injected RNN body) has unknown architecture;
    # we take body_x directly, which the module's forward() explicitly supports.
    # TODO(synk): std_cond_in=True / tanh_on_dist / clamp_log_std variants not
    # implemented (module defaults are False).
    b, t = body_x.shape[0], body_x.shape[1]
    h = body_x.shape[-1]
    d_tot = discrete_action_dim * num_discrete_actions
    n = b * t
    x2d = body_x.reshape(n, h)

    if use_pallas is None:
        use_pallas = n >= min_rows_for_pallas

    if use_pallas:
        fused = _run_heads(x2d, params["w_fused"], params["b_fused"])
        mean2d = fused[:, :cont_action_dim].astype(jnp.float32)
        logits2d = fused[:, cont_action_dim:cont_action_dim + d_tot].astype(jnp.float32)
    else:
        mean2d = jnp.dot(x2d, params["w_mean"]) + params["b_mean"]
        logits2d = jnp.dot(x2d, params["w_disc"]) + params["b_disc"]

    # std_cond_in=False: std = exp(log_std) is x-independent -> wrapper-side,
    # broadcast lazily instead of writing a constant array from the kernel.
    std_row = jnp.exp(params["log_std"])

    if t == 1:
        mean_cont = mean2d
        std = jnp.broadcast_to(std_row, mean_cont.shape)
        discrete_logits = logits2d.reshape(-1, num_discrete_actions,
                                           discrete_action_dim)
    else:
        mean_cont = mean2d.reshape(b, t, cont_action_dim)
        std = jnp.broadcast_to(std_row, mean_cont.shape)
        discrete_logits = logits2d.reshape(b, t, num_discrete_actions,
                                           discrete_action_dim)

    return (mean_cont, std), discrete_logits, body_x, hidden_state


if __name__ == "__main__":
    # small shapes consistent with the module's forward
    B, T, H = 2, 8, 32           # batch, sequence, body hidden size (in_features)
    CONT_DIM = 12                # cont_action_dim
    DISC_DIM = 10                # discrete_action_dim
    NUM_DISC = 4                 # num_discrete_actions
    INIT_LOG_STD = -0.51

    key = jax.random.PRNGKey(0)
    k_param, k_x, k_x2 = jax.random.split(key, 3)

    params = init_params(k_param, H, CONT_DIM, DISC_DIM, NUM_DISC,
                         init_log_std=INIT_LOG_STD)
    body_x = jax.random.normal(k_x, (B, T, H), dtype=jnp.float32)

    (mean_cont, std), disc_logits, body_out, hidden = rnn_mixed_policy_forward(
        params, body_x,
        cont_action_dim=CONT_DIM,
        discrete_action_dim=DISC_DIM,
        num_discrete_actions=NUM_DISC,
        use_pallas=True)   # force the Pallas path at demo-sized N

    jax.block_until_ready((mean_cont, std, disc_logits))

    assert mean_cont.shape == (B, T, CONT_DIM)
    assert std.shape == (B, T, CONT_DIM)
    assert disc_logits.shape == (B, T, NUM_DISC, DISC_DIM)

    # correctness vs full-precision f32 reference (tolerance covers only the
    # final bf16 store rounding; MXU operands stay f32)
    x_flat = body_x.reshape(B * T, H)
    ref_mean = (jnp.dot(x_flat, params["w_mean"],
                        precision=jax.lax.Precision.HIGHEST)
                + params["b_mean"])
    ref_logits = (jnp.dot(x_flat, params["w_disc"],
                          precision=jax.lax.Precision.HIGHEST)
                  + params["b_disc"])
    assert jnp.allclose(mean_cont.reshape(B * T, -1), ref_mean, atol=2e-2)
    assert jnp.allclose(disc_logits.reshape(B * T, -1), ref_logits, atol=2e-2)
    assert jnp.allclose(std, jnp.exp(jnp.float32(INIT_LOG_STD)), atol=1e-6)

    # Second case: N = 520 rows -> auto-dispatch picks the kernel, the row grid
    # has 2 steps (v7x TC split) and the last tile overhangs, exercising the
    # ragged-grid path that replaced the wrapper-side jnp.pad.
    B2, T2 = 4, 130
    body_x2 = jax.random.normal(k_x2, (B2, T2, H), dtype=jnp.float32)
    (mean2, std2), logits2, _, _ = rnn_mixed_policy_forward(
        params, body_x2,
        cont_action_dim=CONT_DIM,
        discrete_action_dim=DISC_DIM,
        num_discrete_actions=NUM_DISC)
    jax.block_until_ready((mean2, std2, logits2))

    assert mean2.shape == (B2, T2, CONT_DIM)
    assert logits2.shape == (B2, T2, NUM_DISC, DISC_DIM)
    x2_flat = body_x2.reshape(B2 * T2, H)
    ref_mean2 = (jnp.dot(x2_flat, params["w_mean"],
                         precision=jax.lax.Precision.HIGHEST)
                 + params["b_mean"])
    ref_logits2 = (jnp.dot(x2_flat, params["w_disc"],
                           precision=jax.lax.Precision.HIGHEST)
                   + params["b_disc"])
    assert jnp.allclose(mean2.reshape(B2 * T2, -1), ref_mean2, atol=2e-2)
    assert jnp.allclose(logits2.reshape(B2 * T2, -1), ref_logits2, atol=2e-2)

    print("KERNEL_OK")
</pallas_src>

<mosaic_0001>
module attributes {stable_mosaic.version = 11 : i64} {
  func.func @_heads_kernel(%arg0: i32, %arg1: memref<16x32xf32, #tpu.memory_space<vmem>>, %arg2: memref<32x128xf32, #tpu.memory_space<vmem>>, %arg3: memref<1x128xf32, #tpu.memory_space<vmem>>, %arg4: memref<16x128xbf16, #tpu.memory_space<vmem>>) attributes {dimension_semantics = [#tpu.dimension_semantics<parallel>], iteration_bounds = array<i64: 1>, scalar_prefetch = 0 : i64, scratch_operands = 0 : i64, tpu.core_type = #tpu.core_type<tc>, window_params = [{transform_indices = @transform_0, window_bounds = array<i64: 16, 32>}, {pipeline_mode = #tpu.pipeline_mode<synchronous>, transform_indices = @transform_1, window_bounds = array<i64: 32, 128>}, {pipeline_mode = #tpu.pipeline_mode<synchronous>, transform_indices = @transform_2, window_bounds = array<i64: 1, 128>}, {transform_indices = @transform_3, window_bounds = array<i64: 16, 128>}]} {
    %c0 = arith.constant 0 : index
    %c0_0 = arith.constant 0 : index
    %0 = vector.load %arg1[%c0, %c0_0] : memref<16x32xf32, #tpu.memory_space<vmem>>, vector<16x32xf32>
    %c0_1 = arith.constant 0 : index
    %c0_2 = arith.constant 0 : index
    %1 = vector.load %arg2[%c0_1, %c0_2] : memref<32x128xf32, #tpu.memory_space<vmem>>, vector<32x128xf32>
    %cst = arith.constant dense<0.000000e+00> : vector<16x128xf32>
    %2 = tpu.matmul %0, %1, %cst {dimension_numbers = #tpu.dot_dimension_numbers<[1], [0], [0], [1], [0, 0, 1, 1], [], []>} : vector<16x32xf32>, vector<32x128xf32>, vector<16x128xf32> -> vector<16x128xf32>
    %c0_3 = arith.constant 0 : index
    %c0_4 = arith.constant 0 : index
    %3 = vector.load %arg3[%c0_3, %c0_4] : memref<1x128xf32, #tpu.memory_space<vmem>>, vector<1x128xf32>
    %4 = vector.broadcast %3 : vector<1x128xf32> to vector<16x128xf32>
    %5 = arith.addf %2, %4 : vector<16x128xf32>
    %6 = arith.truncf %5 : vector<16x128xf32> to vector<16x128xbf16>
    %c0_5 = arith.constant 0 : index
    %c0_6 = arith.constant 0 : index
    %7 = vector.load %arg4[%c0_5, %c0_6] : memref<16x128xbf16, #tpu.memory_space<vmem>>, vector<16x128xbf16>
    tpu.vector_store %arg4[%c0_5, %c0_6], %6 {strides = array<i32>} : memref<16x128xbf16, #tpu.memory_space<vmem>>, vector<16x128xbf16>,
    return
  }
  func.func @transform_0(%arg0: i32) -> (i32, i32) {
    %c0_i32 = arith.constant 0 : i32
    %c0_i32_0 = arith.constant 0 : i32
    return %arg0, %c0_i32 : i32, i32
  }
  func.func @transform_1(%arg0: i32) -> (i32, i32) {
    %c0_i32 = arith.constant 0 : i32
    %c0_i32_0 = arith.constant 0 : i32
    %c0_i32_1 = arith.constant 0 : i32
    return %c0_i32, %c0_i32_0 : i32, i32
  }
  func.func @transform_2(%arg0: i32) -> (i32, i32) {
    %c0_i32 = arith.constant 0 : i32
    %c0_i32_0 = arith.constant 0 : i32
    %c0_i32_1 = arith.constant 0 : i32
    return %c0_i32, %c0_i32_0 : i32, i32
  }
  func.func @transform_3(%arg0: i32) -> (i32, i32) {
    %c0_i32 = arith.constant 0 : i32
    %c0_i32_0 = arith.constant 0 : i32
    return %arg0, %c0_i32 : i32, i32
  }
}

</mosaic_0001>

<bundles_post_ra>
// kernel: tpu_custom_call.1
= control target key start
LH: loop header
LB: loop body
LE: loop exit
PB: predicated region body
PF: predicated region fallthrough
CT: control target
= control target key end

     0   :  { %8 = vsyncpa [#allocation3], 0  ;;  %s247_s0 = inlined_call_operand.hbm [shape: f32[16,32], index: 0, kind: input, shape index: {}]   ;;  %s248_s1 = inlined_call_operand.hbm [shape: f32[32,128], index: 1, kind: input, shape index: {}]   ;;  %s249_s2 = inlined_call_operand.vmem [shape: f32[1,128], index: 2, kind: input, shape index: {}]   ;;  %s250_s3 = inlined_call_operand.hbm [shape: bf16[16,128], index: 3, kind: output, shape index: {}]  }
   0x1   :  { %9 = vsyncpa [#allocation6], 0 }
   0x2   :  { %10 = vsyncpa [#allocation4], 0  ;;  %s15_s14 = sshll.u32 %s247_s0, 4  ;;  %s208_s15 = smov [#allocation2]   ;;  %s16_s14 = int_to_ptr.hbm [resolvable:$true] %s15_s14 }
   0x3   :  { %s17_s16 = sshll.u32 %s208_s15, 4  ;;  %s28_s19 = sshll.u32 %s248_s1, 4  ;;  %s18_s16 = int_to_ptr.vmem [resolvable:$true] %s17_s16  ;;  %s29_s19 = int_to_ptr.hbm [resolvable:$true] %s28_s19 }
   0x4   :  { %s209_s20 = smov 128   ;;  %s210_s21 = smov 8  }
   0x5   :  { %23 = dma.hbm_to_vmem [thread:$0]  %s16_s14, 256, %s18_s16, [#allocation3], %s209_s20, %s209_s20, %s210_s21  }
   0x6   :  { %s211_s22 = smov [#allocation5]  }
   0x7   :  { %s30_s23 = sshll.u32 %s211_s22, 4  ;;  %s31_s23 = int_to_ptr.vmem [resolvable:$true] %s30_s23 }
   0x8   :  { %36 = dma.hbm_to_vmem [thread:$0]  %s29_s19, 512, %s31_s23, [#allocation6], %s209_s20, %s209_s20, %s210_s21  }
   0x9   :  { %202 = dma.done.wait [#allocation3], 256  }
   0xa   :  { %203 = vsyncadd [#allocation3], 4294967040 }
   0xb   :  { %204 = dma.done.wait [#allocation6], 512  }
   0xc   :  { %205 = vsyncadd [#allocation6], 4294966784  ;;  %v52_v0 = vld [vmem:[#allocation5 + $0x18] sm:$0xff]  ;;  %v51_v1 = vld [vmem:[#allocation5 + $0x10] sm:$0xff]  ;;  %vm57_vm0 = vcmask 261120   ;;  %s212_s24 = smov [#allocation7]  }
   0xd   :  { %76 = vmatpush.msra.mxu0 %v52_v0  ;;  %118 = vmatpush.msra.mxu1 %v52_v0  ;;  %v50_v2 = vld [vmem:[#allocation5 + $0x8] sm:$0xff]  ;;  %v49_v3 = vld [vmem:[#allocation5] sm:$0xff]  ;;  %v47_v4 = vld [vmem:[#allocation2] sm:$0xff]  ;;  %s95_s25 = sshll.u32 %s212_s24, 4  ;;  %s97_s28 = sshll.u32 %s250_s3, 4  ;;  %s96_s25 = int_to_ptr.vmem [resolvable:$true] %s95_s25  ;;  %s98_s28 = int_to_ptr.hbm [resolvable:$true] %s97_s28 }
   0xe   :  { %v48_v5 = vld [vmem:[#allocation2 + $0x8] sm:$0xff]  ;;  %v129_v6 = vld [vmem:[%s249_s2] ss:$0 sm:$0xff]  ;;  %s213_s29 = smov 64   ;;  %s214_s30 = smov 4  }
   0xf   :  { %77 = vmatpush.msra.mxu0 %v51_v1  ;;  %119 = vmatpush.msra.mxu1 %v51_v1 }
  0x11   :  { %78 = vmatpush.msra.mxu0 %v50_v2  ;;  %120 = vmatpush.msra.mxu1 %v50_v2 }
  0x13   :  { %79 = vmatpush.msra.mxu0 %v49_v3  ;;  %121 = vmatpush.msra.mxu1 %v49_v3 }
  0x14   :  { %111 = vmatmul.msk.f32.vlgmr.msra.gmra.mxu0 %vm57_vm0, %v47_v4  ;;  %112 = vmatmul.msk.f32.vlgmr.msra.gmra.mxu1 %vm57_vm0, %v48_v5 }
  0x91   :  { %v81_v7 = vpop.f32.mrf.mxu0  ;;  %v84_v8 = vpop.f32.mrf.mxu1 }
  0x92   :  { %v82_v9 = vadd.f32 %v129_v6, %v81_v7  ;;  %v85_v10 = vadd.f32 %v129_v6, %v84_v8 }
  0x94   :  { %v116_v11 = vpack.c.bf16 %v85_v10, %v82_v9 }
  0x96   :  { %117 = vst [vmem:[#allocation7] sm:$0xff] %v116_v11  }
  0x97   :  { %103 = dma.vmem_to_hbm [thread:$0]  %s96_s25, 128, %s98_s28, [#allocation4], %s213_s29, %s213_s29, %s214_s30  }
  0x98   :  { %206 = dma.done.wait [#allocation4], 128  }
  0x99   :  { %207 = vsyncadd [#allocation4], 4294967168 }
  0x9a   :  { %108 = vsyncpa [#allocation3], 1 }
  0x9b   :  { %109 = vsyncpa [#allocation6], 1 }
  0x9c   :  { %110 = vsyncpa [#allocation4], 1 }

</bundles_post_ra>
